<compile_context>
chip_gen: v7x
topology: tpu7x:2x2x1
jax: 0.10.0
libtpu: 0.0.40
codegen_flags: <defaults>
</compile_context>

<pallas_src>
import jax
import jax.numpy as jnp
from jax.experimental import pallas as pl
from jax.experimental.pallas import tpu as pltpu


def _se_small_c_kernel(x_ref, xse_ref, w1_ref, b1_ref, w2_ref, b2_ref, o_ref):
    # x_ref, xse_ref, o_ref: (1, C, ts) VMEM blocks (input dtype)
    # w1_ref, w2_ref: (C, C) f32 in SMEM; b1_ref, b2_ref: (C,) f32 in SMEM
    C = x_ref.shape[1]
    xse = xse_ref[0].astype(jnp.float32)                       # (C, ts)

    def conv1x1(w_ref, b_ref, v, relu):
        rows = []
        for o in range(C):
            acc = v[0:1, :] * w_ref[o, 0]
            for i in range(1, C):
                acc = acc + v[i:i + 1, :] * w_ref[o, i]
            acc = acc + b_ref[o]
            if relu:
                acc = jnp.maximum(acc, 0.0)
            rows.append(acc)
        return jnp.concatenate(rows, axis=0)                   # (C, ts)

    h = conv1x1(w1_ref, b1_ref, xse, relu=True)                # conv_reduce + ReLU
    s = conv1x1(w2_ref, b2_ref, h, relu=False)                 # conv_expand
    # TODO(synk): the reference forward never applies the Sigmoid gate, so we don't either.
    o_ref[0] = (x_ref[0].astype(jnp.float32) * s).astype(o_ref.dtype)


def _se_mxu_kernel(x_ref, xse_ref, w1_ref, b1_ref, w2_ref, b2_ref, o_ref):
    # x_ref, xse_ref, o_ref: (1, C, ts); w*_ref: (C, C) f32 VMEM; b*_ref: (C, 1) f32 VMEM
    xse = xse_ref[0].astype(jnp.float32)                                        # (C, ts)
    h = jnp.dot(w1_ref[...], xse, preferred_element_type=jnp.float32) + b1_ref[...]
    h = jnp.maximum(h, 0.0)
    s = jnp.dot(w2_ref[...], h, preferred_element_type=jnp.float32) + b2_ref[...]
    o_ref[0] = (x_ref[0].astype(jnp.float32) * s).astype(o_ref.dtype)


def se_forward(x, x_se, w1, b1, w2, b2, *, spatial_tile=None):
    """x, x_se: NCHW arrays.  w1, w2: (C, C) 1x1-conv weights (O, I).  b1, b2: (C,)."""
    N, C, H, W = x.shape
    assert x_se.shape == (N, C, H, W)
    HW = H * W

    # NCHW -> (N, C, H*W): contiguous reshape, no transpose, no extra HBM traffic.
    x_f = x.reshape(N, C, HW)
    xse_f = x_se.reshape(N, C, HW)

    itemsize = jnp.dtype(x.dtype).itemsize
    padded_c = ((C + 7) // 8) * 8            # sublane padding of the (C, ts) tiles

    # ~1.5 MiB (sublane-padded, f32) per streamed block: the op is HBM-bandwidth-bound,
    # so big tiles amortize per-grid-step overhead while keeping total VMEM (pipeline
    # buffers + in-body f32 intermediates) comfortably under 32 MiB (v7x-safe).
    if spatial_tile is None:
        spatial_tile = (3 << 20) // (2 * padded_c * max(itemsize, 4))
    ts = max(128, int(spatial_tile))
    if HW <= ts:
        ts = HW                              # block == full dim, always legal
    elif ts >= 512:
        ts = (ts // 512) * 512
    else:
        ts = (ts // 128) * 128               # lane alignment (128-native, v5e-friendly)

    # Keep at least 2 grid steps so both v7x TensorCores stream.
    if N * pl.cdiv(HW, ts) < 2 and HW > 1024:
        ts = min(ts, max(512, pl.cdiv(pl.cdiv(HW, 2), 512) * 512))

    # No padding of the inputs: partial last block is handled by clamped DMAs.
    grid = (N, pl.cdiv(HW, ts))

    small_c = C <= 8
    if small_c:
        kernel = _se_small_c_kernel
        params = (w1.astype(jnp.float32), b1.astype(jnp.float32),
                  w2.astype(jnp.float32), b2.astype(jnp.float32))
        param_specs = [pl.BlockSpec(memory_space=pltpu.MemorySpace.SMEM)] * 4
    else:
        kernel = _se_mxu_kernel
        params = (w1.astype(jnp.float32), b1.reshape(C, 1).astype(jnp.float32),
                  w2.astype(jnp.float32), b2.reshape(C, 1).astype(jnp.float32))
        param_specs = [
            pl.BlockSpec((C, C), lambda n, j: (0, 0)),   # W1 (grid-invariant)
            pl.BlockSpec((C, 1), lambda n, j: (0, 0)),   # b1
            pl.BlockSpec((C, C), lambda n, j: (0, 0)),   # W2
            pl.BlockSpec((C, 1), lambda n, j: (0, 0)),   # b2
        ]

    # VMEM budget: 3 streams x 2 pipeline buffers of the sublane-padded tile, plus a
    # pessimistic estimate of in-body f32 intermediates, plus headroom. Cap 32 MiB (v7x).
    buf_bytes = 3 * 2 * padded_c * ts * itemsize
    if small_c:
        scratch_bytes = (2 * C + 6) * 8 * ts * 4
    else:
        scratch_bytes = 3 * padded_c * ts * 4
    vmem_limit = int(min(max(buf_bytes + scratch_bytes + (2 << 20), 16 << 20), 32 << 20))

    cost = pl.CostEstimate(
        flops=4 * N * HW * C * C + 3 * N * HW * C,
        transcendentals=0,
        bytes_accessed=3 * N * C * HW * itemsize + 4 * C * C * 4,
    )

    out_f = pl.pallas_call(
        kernel,
        out_shape=jax.ShapeDtypeStruct((N, C, HW), x.dtype),
        grid_spec=pltpu.PrefetchScalarGridSpec(
            num_scalar_prefetch=0,
            grid=grid,
            in_specs=[
                pl.BlockSpec((1, C, ts), lambda n, j: (n, 0, j)),   # x
                pl.BlockSpec((1, C, ts), lambda n, j: (n, 0, j)),   # x_se
                *param_specs,
            ],
            out_specs=pl.BlockSpec((1, C, ts), lambda n, j: (n, 0, j)),
        ),
        compiler_params=pltpu.CompilerParams(
            dimension_semantics=("parallel", "parallel"),
            vmem_limit_bytes=vmem_limit,
        ),
        cost_estimate=cost,
    )(x_f, xse_f, *params)

    return out_f.reshape(N, C, H, W)


def _reference(x, x_se, w1, b1, w2, b2):
    # Pure-JAX f32 reference of the module's forward (1x1 convs over the channel axis).
    h = jnp.einsum("oc,nchw->nohw", w1, x_se,
                   preferred_element_type=jnp.float32) + b1[None, :, None, None]
    h = jnp.maximum(h, 0.0)
    s = jnp.einsum("oc,nchw->nohw", w2, h,
                   preferred_element_type=jnp.float32) + b2[None, :, None, None]
    return x * s


if __name__ == "__main__":
    key = jax.random.PRNGKey(0)
    N, C, H, W = 2, 4, 16, 16  # small shapes consistent with the module

    k_x, k_xse, k_w1, k_b1, k_w2, k_b2 = jax.random.split(key, 6)
    x = jax.random.normal(k_x, (N, C, H, W), dtype=jnp.float32)
    x_se = jax.random.normal(k_xse, (N, C, H, W), dtype=jnp.float32)

    # parameter shapes from nn.Conv2d(C, C, kernel_size=1, bias=True), (O, I, 1, 1) squeezed
    w1 = jax.random.normal(k_w1, (C, C), dtype=jnp.float32) * 0.1  # conv_reduce weight
    b1 = jax.random.normal(k_b1, (C,), dtype=jnp.float32) * 0.1
    w2 = jax.random.normal(k_w2, (C, C), dtype=jnp.float32) * 0.1  # conv_expand weight
    b2 = jax.random.normal(k_b2, (C,), dtype=jnp.float32) * 0.1

    out = se_forward(x, x_se, w1, b1, w2, b2)
    jax.block_until_ready(out)
    ref = _reference(x, x_se, w1, b1, w2, b2)
    assert out.shape == (N, C, H, W)
    assert jnp.allclose(out, ref, atol=1e-4, rtol=1e-4), "mismatch vs reference"

    # Also exercise the no-pad partial-final-block path (HW not divisible by ts).
    k_a, k_b = jax.random.split(key, 2)
    x2 = jax.random.normal(k_a, (1, C, 20, 20), dtype=jnp.float32)
    xse2 = jax.random.normal(k_b, (1, C, 20, 20), dtype=jnp.float32)
    out2 = se_forward(x2, xse2, w1, b1, w2, b2, spatial_tile=128)
    jax.block_until_ready(out2)
    ref2 = _reference(x2, xse2, w1, b1, w2, b2)
    assert jnp.allclose(out2, ref2, atol=1e-4, rtol=1e-4), "partial-block mismatch"

    print("KERNEL_OK")
</pallas_src>

<mosaic_0001>
module attributes {stable_mosaic.version = 11 : i64} {
  func.func @_se_small_c_kernel(%arg0: i32, %arg1: i32, %arg2: memref<1x4x256xf32, #tpu.memory_space<vmem>>, %arg3: memref<1x4x256xf32, #tpu.memory_space<vmem>>, %arg4: memref<4x4xf32, #tpu.memory_space<smem>>, %arg5: memref<4xf32, #tpu.memory_space<smem>>, %arg6: memref<4x4xf32, #tpu.memory_space<smem>>, %arg7: memref<4xf32, #tpu.memory_space<smem>>, %arg8: memref<1x4x256xf32, #tpu.memory_space<vmem>>) attributes {dimension_semantics = [#tpu.dimension_semantics<parallel>, #tpu.dimension_semantics<parallel>], iteration_bounds = array<i64: 2, 1>, scalar_prefetch = 0 : i64, scratch_operands = 0 : i64, tpu.core_type = #tpu.core_type<tc>, window_params = [{transform_indices = @transform_0, window_bounds = array<i64: 1, 4, 256>}, {transform_indices = @transform_1, window_bounds = array<i64: 1, 4, 256>}, {transform_indices = @transform_2, window_bounds = array<i64: 4, 4>}, {transform_indices = @transform_3, window_bounds = array<i64: 4>}, {transform_indices = @transform_4, window_bounds = array<i64: 4, 4>}, {transform_indices = @transform_5, window_bounds = array<i64: 4>}, {transform_indices = @transform_6, window_bounds = array<i64: 1, 4, 256>}]} {
    %c0 = arith.constant 0 : index
    %c0_0 = arith.constant 0 : index
    %c0_1 = arith.constant 0 : index
    %0 = vector.load %arg3[%c0, %c0_0, %c0_1] : memref<1x4x256xf32, #tpu.memory_space<vmem>>, vector<1x4x256xf32>
    %1 = vector.shape_cast %0 : vector<1x4x256xf32> to vector<4x256xf32>
    %2 = vector.extract_strided_slice %1 {offsets = [0, 0], sizes = [1, 256], strides = [1, 1]} : vector<4x256xf32> to vector<1x256xf32>
    %c0_2 = arith.constant 0 : index
    %c0_3 = arith.constant 0 : index
    %3 = memref.load %arg4[%c0_2, %c0_3] : memref<4x4xf32, #tpu.memory_space<smem>>
    %4 = vector.broadcast %3 : f32 to vector<1x256xf32>
    %5 = arith.mulf %2, %4 : vector<1x256xf32>
    %6 = vector.extract_strided_slice %1 {offsets = [1, 0], sizes = [1, 256], strides = [1, 1]} : vector<4x256xf32> to vector<1x256xf32>
    %c0_4 = arith.constant 0 : index
    %c1 = arith.constant 1 : index
    %7 = memref.load %arg4[%c0_4, %c1] : memref<4x4xf32, #tpu.memory_space<smem>>
    %8 = vector.broadcast %7 : f32 to vector<1x256xf32>
    %9 = arith.mulf %6, %8 : vector<1x256xf32>
    %10 = arith.addf %5, %9 : vector<1x256xf32>
    %11 = vector.extract_strided_slice %1 {offsets = [2, 0], sizes = [1, 256], strides = [1, 1]} : vector<4x256xf32> to vector<1x256xf32>
    %c0_5 = arith.constant 0 : index
    %c2 = arith.constant 2 : index
    %12 = memref.load %arg4[%c0_5, %c2] : memref<4x4xf32, #tpu.memory_space<smem>>
    %13 = vector.broadcast %12 : f32 to vector<1x256xf32>
    %14 = arith.mulf %11, %13 : vector<1x256xf32>
    %15 = arith.addf %10, %14 : vector<1x256xf32>
    %16 = vector.extract_strided_slice %1 {offsets = [3, 0], sizes = [1, 256], strides = [1, 1]} : vector<4x256xf32> to vector<1x256xf32>
    %c0_6 = arith.constant 0 : index
    %c3 = arith.constant 3 : index
    %17 = memref.load %arg4[%c0_6, %c3] : memref<4x4xf32, #tpu.memory_space<smem>>
    %18 = vector.broadcast %17 : f32 to vector<1x256xf32>
    %19 = arith.mulf %16, %18 : vector<1x256xf32>
    %20 = arith.addf %15, %19 : vector<1x256xf32>
    %c0_7 = arith.constant 0 : index
    %21 = memref.load %arg5[%c0_7] : memref<4xf32, #tpu.memory_space<smem>>
    %22 = vector.broadcast %21 : f32 to vector<1x256xf32>
    %23 = arith.addf %20, %22 : vector<1x256xf32>
    %cst = arith.constant 0.000000e+00 : f32
    %24 = vector.broadcast %cst : f32 to vector<1x256xf32>
    %25 = arith.maximumf %23, %24 : vector<1x256xf32>
    %26 = vector.extract_strided_slice %1 {offsets = [0, 0], sizes = [1, 256], strides = [1, 1]} : vector<4x256xf32> to vector<1x256xf32>
    %c1_8 = arith.constant 1 : index
    %c0_9 = arith.constant 0 : index
    %27 = memref.load %arg4[%c1_8, %c0_9] : memref<4x4xf32, #tpu.memory_space<smem>>
    %28 = vector.broadcast %27 : f32 to vector<1x256xf32>
    %29 = arith.mulf %26, %28 : vector<1x256xf32>
    %30 = vector.extract_strided_slice %1 {offsets = [1, 0], sizes = [1, 256], strides = [1, 1]} : vector<4x256xf32> to vector<1x256xf32>
    %c1_10 = arith.constant 1 : index
    %c1_11 = arith.constant 1 : index
    %31 = memref.load %arg4[%c1_10, %c1_11] : memref<4x4xf32, #tpu.memory_space<smem>>
    %32 = vector.broadcast %31 : f32 to vector<1x256xf32>
    %33 = arith.mulf %30, %32 : vector<1x256xf32>
    %34 = arith.addf %29, %33 : vector<1x256xf32>
    %35 = vector.extract_strided_slice %1 {offsets = [2, 0], sizes = [1, 256], strides = [1, 1]} : vector<4x256xf32> to vector<1x256xf32>
    %c1_12 = arith.constant 1 : index
    %c2_13 = arith.constant 2 : index
    %36 = memref.load %arg4[%c1_12, %c2_13] : memref<4x4xf32, #tpu.memory_space<smem>>
    %37 = vector.broadcast %36 : f32 to vector<1x256xf32>
    %38 = arith.mulf %35, %37 : vector<1x256xf32>
    %39 = arith.addf %34, %38 : vector<1x256xf32>
    %40 = vector.extract_strided_slice %1 {offsets = [3, 0], sizes = [1, 256], strides = [1, 1]} : vector<4x256xf32> to vector<1x256xf32>
    %c1_14 = arith.constant 1 : index
    %c3_15 = arith.constant 3 : index
    %41 = memref.load %arg4[%c1_14, %c3_15] : memref<4x4xf32, #tpu.memory_space<smem>>
    %42 = vector.broadcast %41 : f32 to vector<1x256xf32>
    %43 = arith.mulf %40, %42 : vector<1x256xf32>
    %44 = arith.addf %39, %43 : vector<1x256xf32>
    %c1_16 = arith.constant 1 : index
    %45 = memref.load %arg5[%c1_16] : memref<4xf32, #tpu.memory_space<smem>>
    %46 = vector.broadcast %45 : f32 to vector<1x256xf32>
    %47 = arith.addf %44, %46 : vector<1x256xf32>
    %cst_17 = arith.constant 0.000000e+00 : f32
    %48 = vector.broadcast %cst_17 : f32 to vector<1x256xf32>
    %49 = arith.maximumf %47, %48 : vector<1x256xf32>
    %50 = vector.extract_strided_slice %1 {offsets = [0, 0], sizes = [1, 256], strides = [1, 1]} : vector<4x256xf32> to vector<1x256xf32>
    %c2_18 = arith.constant 2 : index
    %c0_19 = arith.constant 0 : index
    %51 = memref.load %arg4[%c2_18, %c0_19] : memref<4x4xf32, #tpu.memory_space<smem>>
    %52 = vector.broadcast %51 : f32 to vector<1x256xf32>
    %53 = arith.mulf %50, %52 : vector<1x256xf32>
    %54 = vector.extract_strided_slice %1 {offsets = [1, 0], sizes = [1, 256], strides = [1, 1]} : vector<4x256xf32> to vector<1x256xf32>
    %c2_20 = arith.constant 2 : index
    %c1_21 = arith.constant 1 : index
    %55 = memref.load %arg4[%c2_20, %c1_21] : memref<4x4xf32, #tpu.memory_space<smem>>
    %56 = vector.broadcast %55 : f32 to vector<1x256xf32>
    %57 = arith.mulf %54, %56 : vector<1x256xf32>
    %58 = arith.addf %53, %57 : vector<1x256xf32>
    %59 = vector.extract_strided_slice %1 {offsets = [2, 0], sizes = [1, 256], strides = [1, 1]} : vector<4x256xf32> to vector<1x256xf32>
    %c2_22 = arith.constant 2 : index
    %c2_23 = arith.constant 2 : index
    %60 = memref.load %arg4[%c2_22, %c2_23] : memref<4x4xf32, #tpu.memory_space<smem>>
    %61 = vector.broadcast %60 : f32 to vector<1x256xf32>
    %62 = arith.mulf %59, %61 : vector<1x256xf32>
    %63 = arith.addf %58, %62 : vector<1x256xf32>
    %64 = vector.extract_strided_slice %1 {offsets = [3, 0], sizes = [1, 256], strides = [1, 1]} : vector<4x256xf32> to vector<1x256xf32>
    %c2_24 = arith.constant 2 : index
    %c3_25 = arith.constant 3 : index
    %65 = memref.load %arg4[%c2_24, %c3_25] : memref<4x4xf32, #tpu.memory_space<smem>>
    %66 = vector.broadcast %65 : f32 to vector<1x256xf32>
    %67 = arith.mulf %64, %66 : vector<1x256xf32>
    %68 = arith.addf %63, %67 : vector<1x256xf32>
    %c2_26 = arith.constant 2 : index
    %69 = memref.load %arg5[%c2_26] : memref<4xf32, #tpu.memory_space<smem>>
    %70 = vector.broadcast %69 : f32 to vector<1x256xf32>
    %71 = arith.addf %68, %70 : vector<1x256xf32>
    %cst_27 = arith.constant 0.000000e+00 : f32
    %72 = vector.broadcast %cst_27 : f32 to vector<1x256xf32>
    %73 = arith.maximumf %71, %72 : vector<1x256xf32>
    %74 = vector.extract_strided_slice %1 {offsets = [0, 0], sizes = [1, 256], strides = [1, 1]} : vector<4x256xf32> to vector<1x256xf32>
    %c3_28 = arith.constant 3 : index
    %c0_29 = arith.constant 0 : index
    %75 = memref.load %arg4[%c3_28, %c0_29] : memref<4x4xf32, #tpu.memory_space<smem>>
    %76 = vector.broadcast %75 : f32 to vector<1x256xf32>
    %77 = arith.mulf %74, %76 : vector<1x256xf32>
    %78 = vector.extract_strided_slice %1 {offsets = [1, 0], sizes = [1, 256], strides = [1, 1]} : vector<4x256xf32> to vector<1x256xf32>
    %c3_30 = arith.constant 3 : index
    %c1_31 = arith.constant 1 : index
    %79 = memref.load %arg4[%c3_30, %c1_31] : memref<4x4xf32, #tpu.memory_space<smem>>
    %80 = vector.broadcast %79 : f32 to vector<1x256xf32>
    %81 = arith.mulf %78, %80 : vector<1x256xf32>
    %82 = arith.addf %77, %81 : vector<1x256xf32>
    %83 = vector.extract_strided_slice %1 {offsets = [2, 0], sizes = [1, 256], strides = [1, 1]} : vector<4x256xf32> to vector<1x256xf32>
    %c3_32 = arith.constant 3 : index
    %c2_33 = arith.constant 2 : index
    %84 = memref.load %arg4[%c3_32, %c2_33] : memref<4x4xf32, #tpu.memory_space<smem>>
    %85 = vector.broadcast %84 : f32 to vector<1x256xf32>
    %86 = arith.mulf %83, %85 : vector<1x256xf32>
    %87 = arith.addf %82, %86 : vector<1x256xf32>
    %88 = vector.extract_strided_slice %1 {offsets = [3, 0], sizes = [1, 256], strides = [1, 1]} : vector<4x256xf32> to vector<1x256xf32>
    %c3_34 = arith.constant 3 : index
    %c3_35 = arith.constant 3 : index
    %89 = memref.load %arg4[%c3_34, %c3_35] : memref<4x4xf32, #tpu.memory_space<smem>>
    %90 = vector.broadcast %89 : f32 to vector<1x256xf32>
    %91 = arith.mulf %88, %90 : vector<1x256xf32>
    %92 = arith.addf %87, %91 : vector<1x256xf32>
    %c3_36 = arith.constant 3 : index
    %93 = memref.load %arg5[%c3_36] : memref<4xf32, #tpu.memory_space<smem>>
    %94 = vector.broadcast %93 : f32 to vector<1x256xf32>
    %95 = arith.addf %92, %94 : vector<1x256xf32>
    %cst_37 = arith.constant 0.000000e+00 : f32
    %96 = vector.broadcast %cst_37 : f32 to vector<1x256xf32>
    %97 = arith.maximumf %95, %96 : vector<1x256xf32>
    %98 = tpu.concatenate %25, %49, %73, %97 in 0 : vector<1x256xf32>, vector<1x256xf32>, vector<1x256xf32>, vector<1x256xf32> -> vector<4x256xf32>
    %99 = vector.extract_strided_slice %98 {offsets = [0, 0], sizes = [1, 256], strides = [1, 1]} : vector<4x256xf32> to vector<1x256xf32>
    %c0_38 = arith.constant 0 : index
    %c0_39 = arith.constant 0 : index
    %100 = memref.load %arg6[%c0_38, %c0_39] : memref<4x4xf32, #tpu.memory_space<smem>>
    %101 = vector.broadcast %100 : f32 to vector<1x256xf32>
    %102 = arith.mulf %99, %101 : vector<1x256xf32>
    %103 = vector.extract_strided_slice %98 {offsets = [1, 0], sizes = [1, 256], strides = [1, 1]} : vector<4x256xf32> to vector<1x256xf32>
    %c0_40 = arith.constant 0 : index
    %c1_41 = arith.constant 1 : index
    %104 = memref.load %arg6[%c0_40, %c1_41] : memref<4x4xf32, #tpu.memory_space<smem>>
    %105 = vector.broadcast %104 : f32 to vector<1x256xf32>
    %106 = arith.mulf %103, %105 : vector<1x256xf32>
    %107 = arith.addf %102, %106 : vector<1x256xf32>
    %108 = vector.extract_strided_slice %98 {offsets = [2, 0], sizes = [1, 256], strides = [1, 1]} : vector<4x256xf32> to vector<1x256xf32>
    %c0_42 = arith.constant 0 : index
    %c2_43 = arith.constant 2 : index
    %109 = memref.load %arg6[%c0_42, %c2_43] : memref<4x4xf32, #tpu.memory_space<smem>>
    %110 = vector.broadcast %109 : f32 to vector<1x256xf32>
    %111 = arith.mulf %108, %110 : vector<1x256xf32>
    %112 = arith.addf %107, %111 : vector<1x256xf32>
    %113 = vector.extract_strided_slice %98 {offsets = [3, 0], sizes = [1, 256], strides = [1, 1]} : vector<4x256xf32> to vector<1x256xf32>
    %c0_44 = arith.constant 0 : index
    %c3_45 = arith.constant 3 : index
    %114 = memref.load %arg6[%c0_44, %c3_45] : memref<4x4xf32, #tpu.memory_space<smem>>
    %115 = vector.broadcast %114 : f32 to vector<1x256xf32>
    %116 = arith.mulf %113, %115 : vector<1x256xf32>
    %117 = arith.addf %112, %116 : vector<1x256xf32>
    %c0_46 = arith.constant 0 : index
    %118 = memref.load %arg7[%c0_46] : memref<4xf32, #tpu.memory_space<smem>>
    %119 = vector.broadcast %118 : f32 to vector<1x256xf32>
    %120 = arith.addf %117, %119 : vector<1x256xf32>
    %121 = vector.extract_strided_slice %98 {offsets = [0, 0], sizes = [1, 256], strides = [1, 1]} : vector<4x256xf32> to vector<1x256xf32>
    %c1_47 = arith.constant 1 : index
    %c0_48 = arith.constant 0 : index
    %122 = memref.load %arg6[%c1_47, %c0_48] : memref<4x4xf32, #tpu.memory_space<smem>>
    %123 = vector.broadcast %122 : f32 to vector<1x256xf32>
    %124 = arith.mulf %121, %123 : vector<1x256xf32>
    %125 = vector.extract_strided_slice %98 {offsets = [1, 0], sizes = [1, 256], strides = [1, 1]} : vector<4x256xf32> to vector<1x256xf32>
    %c1_49 = arith.constant 1 : index
    %c1_50 = arith.constant 1 : index
    %126 = memref.load %arg6[%c1_49, %c1_50] : memref<4x4xf32, #tpu.memory_space<smem>>
    %127 = vector.broadcast %126 : f32 to vector<1x256xf32>
    %128 = arith.mulf %125, %127 : vector<1x256xf32>
    %129 = arith.addf %124, %128 : vector<1x256xf32>
    %130 = vector.extract_strided_slice %98 {offsets = [2, 0], sizes = [1, 256], strides = [1, 1]} : vector<4x256xf32> to vector<1x256xf32>
    %c1_51 = arith.constant 1 : index
    %c2_52 = arith.constant 2 : index
    %131 = memref.load %arg6[%c1_51, %c2_52] : memref<4x4xf32, #tpu.memory_space<smem>>
    %132 = vector.broadcast %131 : f32 to vector<1x256xf32>
    %133 = arith.mulf %130, %132 : vector<1x256xf32>
    %134 = arith.addf %129, %133 : vector<1x256xf32>
    %135 = vector.extract_strided_slice %98 {offsets = [3, 0], sizes = [1, 256], strides = [1, 1]} : vector<4x256xf32> to vector<1x256xf32>
    %c1_53 = arith.constant 1 : index
    %c3_54 = arith.constant 3 : index
    %136 = memref.load %arg6[%c1_53, %c3_54] : memref<4x4xf32, #tpu.memory_space<smem>>
    %137 = vector.broadcast %136 : f32 to vector<1x256xf32>
    %138 = arith.mulf %135, %137 : vector<1x256xf32>
    %139 = arith.addf %134, %138 : vector<1x256xf32>
    %c1_55 = arith.constant 1 : index
    %140 = memref.load %arg7[%c1_55] : memref<4xf32, #tpu.memory_space<smem>>
    %141 = vector.broadcast %140 : f32 to vector<1x256xf32>
    %142 = arith.addf %139, %141 : vector<1x256xf32>
    %143 = vector.extract_strided_slice %98 {offsets = [0, 0], sizes = [1, 256], strides = [1, 1]} : vector<4x256xf32> to vector<1x256xf32>
    %c2_56 = arith.constant 2 : index
    %c0_57 = arith.constant 0 : index
    %144 = memref.load %arg6[%c2_56, %c0_57] : memref<4x4xf32, #tpu.memory_space<smem>>
    %145 = vector.broadcast %144 : f32 to vector<1x256xf32>
    %146 = arith.mulf %143, %145 : vector<1x256xf32>
    %147 = vector.extract_strided_slice %98 {offsets = [1, 0], sizes = [1, 256], strides = [1, 1]} : vector<4x256xf32> to vector<1x256xf32>
    %c2_58 = arith.constant 2 : index
    %c1_59 = arith.constant 1 : index
    %148 = memref.load %arg6[%c2_58, %c1_59] : memref<4x4xf32, #tpu.memory_space<smem>>
    %149 = vector.broadcast %148 : f32 to vector<1x256xf32>
    %150 = arith.mulf %147, %149 : vector<1x256xf32>
    %151 = arith.addf %146, %150 : vector<1x256xf32>
    %152 = vector.extract_strided_slice %98 {offsets = [2, 0], sizes = [1, 256], strides = [1, 1]} : vector<4x256xf32> to vector<1x256xf32>
    %c2_60 = arith.constant 2 : index
    %c2_61 = arith.constant 2 : index
    %153 = memref.load %arg6[%c2_60, %c2_61] : memref<4x4xf32, #tpu.memory_space<smem>>
    %154 = vector.broadcast %153 : f32 to vector<1x256xf32>
    %155 = arith.mulf %152, %154 : vector<1x256xf32>
    %156 = arith.addf %151, %155 : vector<1x256xf32>
    %157 = vector.extract_strided_slice %98 {offsets = [3, 0], sizes = [1, 256], strides = [1, 1]} : vector<4x256xf32> to vector<1x256xf32>
    %c2_62 = arith.constant 2 : index
    %c3_63 = arith.constant 3 : index
    %158 = memref.load %arg6[%c2_62, %c3_63] : memref<4x4xf32, #tpu.memory_space<smem>>
    %159 = vector.broadcast %158 : f32 to vector<1x256xf32>
    %160 = arith.mulf %157, %159 : vector<1x256xf32>
    %161 = arith.addf %156, %160 : vector<1x256xf32>
    %c2_64 = arith.constant 2 : index
    %162 = memref.load %arg7[%c2_64] : memref<4xf32, #tpu.memory_space<smem>>
    %163 = vector.broadcast %162 : f32 to vector<1x256xf32>
    %164 = arith.addf %161, %163 : vector<1x256xf32>
    %165 = vector.extract_strided_slice %98 {offsets = [0, 0], sizes = [1, 256], strides = [1, 1]} : vector<4x256xf32> to vector<1x256xf32>
    %c3_65 = arith.constant 3 : index
    %c0_66 = arith.constant 0 : index
    %166 = memref.load %arg6[%c3_65, %c0_66] : memref<4x4xf32, #tpu.memory_space<smem>>
    %167 = vector.broadcast %166 : f32 to vector<1x256xf32>
    %168 = arith.mulf %165, %167 : vector<1x256xf32>
    %169 = vector.extract_strided_slice %98 {offsets = [1, 0], sizes = [1, 256], strides = [1, 1]} : vector<4x256xf32> to vector<1x256xf32>
    %c3_67 = arith.constant 3 : index
    %c1_68 = arith.constant 1 : index
    %170 = memref.load %arg6[%c3_67, %c1_68] : memref<4x4xf32, #tpu.memory_space<smem>>
    %171 = vector.broadcast %170 : f32 to vector<1x256xf32>
    %172 = arith.mulf %169, %171 : vector<1x256xf32>
    %173 = arith.addf %168, %172 : vector<1x256xf32>
    %174 = vector.extract_strided_slice %98 {offsets = [2, 0], sizes = [1, 256], strides = [1, 1]} : vector<4x256xf32> to vector<1x256xf32>
    %c3_69 = arith.constant 3 : index
    %c2_70 = arith.constant 2 : index
    %175 = memref.load %arg6[%c3_69, %c2_70] : memref<4x4xf32, #tpu.memory_space<smem>>
    %176 = vector.broadcast %175 : f32 to vector<1x256xf32>
    %177 = arith.mulf %174, %176 : vector<1x256xf32>
    %178 = arith.addf %173, %177 : vector<1x256xf32>
    %179 = vector.extract_strided_slice %98 {offsets = [3, 0], sizes = [1, 256], strides = [1, 1]} : vector<4x256xf32> to vector<1x256xf32>
    %c3_71 = arith.constant 3 : index
    %c3_72 = arith.constant 3 : index
    %180 = memref.load %arg6[%c3_71, %c3_72] : memref<4x4xf32, #tpu.memory_space<smem>>
    %181 = vector.broadcast %180 : f32 to vector<1x256xf32>
    %182 = arith.mulf %179, %181 : vector<1x256xf32>
    %183 = arith.addf %178, %182 : vector<1x256xf32>
    %c3_73 = arith.constant 3 : index
    %184 = memref.load %arg7[%c3_73] : memref<4xf32, #tpu.memory_space<smem>>
    %185 = vector.broadcast %184 : f32 to vector<1x256xf32>
    %186 = arith.addf %183, %185 : vector<1x256xf32>
    %187 = tpu.concatenate %120, %142, %164, %186 in 0 : vector<1x256xf32>, vector<1x256xf32>, vector<1x256xf32>, vector<1x256xf32> -> vector<4x256xf32>
    %c0_74 = arith.constant 0 : index
    %c0_75 = arith.constant 0 : index
    %c0_76 = arith.constant 0 : index
    %188 = vector.load %arg2[%c0_74, %c0_75, %c0_76] : memref<1x4x256xf32, #tpu.memory_space<vmem>>, vector<1x4x256xf32>
    %189 = vector.shape_cast %188 : vector<1x4x256xf32> to vector<4x256xf32>
    %190 = arith.mulf %189, %187 : vector<4x256xf32>
    %c0_77 = arith.constant 0 : index
    %c0_78 = arith.constant 0 : index
    %c0_79 = arith.constant 0 : index
    %191 = vector.load %arg8[%c0_77, %c0_78, %c0_79] : memref<1x4x256xf32, #tpu.memory_space<vmem>>, vector<1x4x256xf32>
    %192 = vector.shape_cast %191 : vector<1x4x256xf32> to vector<4x256xf32>
    %193 = vector.shape_cast %190 : vector<4x256xf32> to vector<1x4x256xf32>
    tpu.vector_store %arg8[%c0_77, %c0_78, %c0_79], %193 {strides = array<i32>} : memref<1x4x256xf32, #tpu.memory_space<vmem>>, vector<1x4x256xf32>,
    return
  }
  func.func @transform_0(%arg0: i32, %arg1: i32) -> (i32, i32, i32) {
    %c0_i32 = arith.constant 0 : i32
    %c0_i32_0 = arith.constant 0 : i32
    return %arg0, %c0_i32, %arg1 : i32, i32, i32
  }
  func.func @transform_1(%arg0: i32, %arg1: i32) -> (i32, i32, i32) {
    %c0_i32 = arith.constant 0 : i32
    %c0_i32_0 = arith.constant 0 : i32
    return %arg0, %c0_i32, %arg1 : i32, i32, i32
  }
  func.func @transform_2(%arg0: i32, %arg1: i32) -> (i32, i32) {
    %c0_i32 = arith.constant 0 : i32
    %c0_i32_0 = arith.constant 0 : i32
    %c0_i32_1 = arith.constant 0 : i32
    return %c0_i32, %c0_i32_0 : i32, i32
  }
  func.func @transform_3(%arg0: i32, %arg1: i32) -> i32 {
    %c0_i32 = arith.constant 0 : i32
    %c0_i32_0 = arith.constant 0 : i32
    return %c0_i32 : i32
  }
  func.func @transform_4(%arg0: i32, %arg1: i32) -> (i32, i32) {
    %c0_i32 = arith.constant 0 : i32
    %c0_i32_0 = arith.constant 0 : i32
    %c0_i32_1 = arith.constant 0 : i32
    return %c0_i32, %c0_i32_0 : i32, i32
  }
  func.func @transform_5(%arg0: i32, %arg1: i32) -> i32 {
    %c0_i32 = arith.constant 0 : i32
    %c0_i32_0 = arith.constant 0 : i32
    return %c0_i32 : i32
  }
  func.func @transform_6(%arg0: i32, %arg1: i32) -> (i32, i32, i32) {
    %c0_i32 = arith.constant 0 : i32
    %c0_i32_0 = arith.constant 0 : i32
    return %arg0, %c0_i32, %arg1 : i32, i32, i32
  }
}

</mosaic_0001>

<bundles_post_ra>
// kernel: tpu_custom_call.1
= control target key start
LH: loop header
LB: loop body
LE: loop exit
PB: predicated region body
PF: predicated region fallthrough
CT: control target
= control target key end

     0   :  { %s1888_s0 = inlined_call_operand.hbm [shape: f32[2,4,256], index: 0, kind: input, shape index: {}]   ;;  %s1889_s1 = inlined_call_operand.hbm [shape: f32[2,4,256], index: 1, kind: input, shape index: {}]   ;;  %s1890_s2 = inlined_call_operand.vmem [shape: f32[4,4], index: 2, kind: input, shape index: {}]   ;;  %s1891_s3 = inlined_call_operand.vmem [shape: f32[4], index: 3, kind: input, shape index: {}]   ;;  %s1892_s4 = inlined_call_operand.vmem [shape: f32[4,4], index: 4, kind: input, shape index: {}]   ;;  %s1893_s5 = inlined_call_operand.vmem [shape: f32[4], index: 5, kind: input, shape index: {}]   ;;  %s1894_s6 = inlined_call_operand.hbm [shape: f32[2,4,256], index: 6, kind: output, shape index: {}]  }
   0x1   :  { %1904 = sst [smem:[#allocation23_spill]] %s1888_s0 }
   0x2   :  { %1905 = sst [smem:[#allocation24_spill]] %s1889_s1 }
   0x3   :  { %1906 = sst [smem:[#allocation25_spill]] %s1890_s2 }
   0x4   :  { %1907 = sst [smem:[#allocation26_spill]] %s1891_s3 }
   0x5   :  { %1908 = sst [smem:[#allocation27_spill]] %s1892_s4 }
   0x6   :  { %1909 = sst [smem:[#allocation28_spill]] %s1893_s5 }
   0x7   :  { %11 = vsyncpa [#allocation3], 0 }
   0x8   :  { %13 = vsyncpa [#allocation3 + $0x1], 0 }
   0x9   :  { %14 = vsyncpa [#allocation7], 0 }
   0xa   :  { %16 = vsyncpa [#allocation7 + $0x1], 0 }
   0xb   :  { %17 = vsyncpa [#allocation5], 0 }
   0xc   :  { %18 = vsyncpa [#allocation10], 0 }
   0xd   :  { %19 = vsyncpa [#allocation13], 0 }
   0xe   :  { %20 = vsyncpa [#allocation4], 0 }
   0xf   :  { %22 = vsyncpa [#allocation4 + $0x1], 0  ;;  %s1384_s21 = smov 0   ;;  %s1386_s22 = smov 0  }
  0x10   :  { %s1388_s23 = smov 0   ;;  %s1390_s24 = smov 0  }
  0x11   :  { %s1392_s25 = smov 0   ;;  %s1394_s26 = smov 0  }
  0x12 LB: > { %1910 = sst [smem:[#allocation21_spill]] %s1336_s25  ;;  %s1911_s3 = sld [smem:[#allocation26_spill]]  ;;  %s1340_s26 = sphi %s1394_s26, %s28_s26   ;;  %s1336_s25 = sphi %s1392_s25, %s1937_s25   ;;  %s1332_s24 = sphi %s1390_s24, %s1936_s24   ;;  %s1328_s23 = sphi %s1388_s23, %s1940_s23   ;;  %s1324_s22 = sphi %s1386_s22, %s1939_s22   ;;  %s1320_s21 = sphi %s1384_s21, %s1938_s21  }
  0x13   : > { %s936_s30 = sadd.s32 4294967295, %s1340_s26   ;;  %p938_p0 = scmp.ge.s32.totalorder %s1340_s26, 1 }
  0x14   : > { %p1421_p1 = scmp.eq.s32.totalorder %s936_s30, 0  ;;  %p213_p2 = scmp.lt.s32.totalorder %s1340_s26, 3 }
  0x15   : > { %s1914_s2 = sld [smem:[#allocation25_spill]]  ;;  %s1916_s4 = sld [smem:[#allocation27_spill]] }
  0x16   : > { %s1912_s7 = scalar_select %p1421_p1, 1, 0 }
  0x17   : > { %p1426_p3 = pnand %p938_p0, %p213_p2  ;;  %s1917_s5 = sld [smem:[#allocation28_spill]] }
  0x18   : > { %s237_s29 = sshll.u32 %s1911_s3, 4  ;;  %s238_s29 = int_to_ptr.vmem [resolvable:$true] %s237_s29 }
  0x19   : > { %s1913_s8 = scalar_select %p1426_p3, 1, 0 }
  0x1a   : > { %p1036_p5 = pneg %p1426_p3  ;;  %s1122_s19 = scalar_lea.vmem %s238_s29, 16 }
  0x1b   : > { %s226_s11 = sshll.u32 %s1914_s2, 4  ;;  %s248_s15 = sshll.u32 %s1916_s4, 4  ;;  %s227_s11 = int_to_ptr.vmem [resolvable:$true] %s226_s11  ;;  %s1445_s15 = int_to_ptr.vmem [resolvable:$true] %s248_s15 }
  0x1c   : > { %p1438_p6 = pnand %p1036_p5, %p1421_p1  ;;  %p1123_p7 = scmp.ne.s32.totalorder %s238_s29, %s1122_s19 }
  0x1d   : > { %s259_s18 = sshll.u32 %s1917_s5, 4  ;;  %p1130_p11 = scmp.lt.s32.totalorder %s238_s29, %s238_s29  ;;  %s260_s18 = int_to_ptr.vmem [resolvable:$true] %s259_s18 }
  0x1e   : > { %p1124_p8 = pneg %p1438_p6  ;;  %p1131_p12 = scmp.lt.s32.totalorder %s1122_s19, %s1122_s19 }
  0x20   : > { %p1125_p9 = pnand %p1124_p8, %p1123_p7  ;;  %p1132_p13 = por %p1131_p12, %p1130_p11 }
  0x22   : > { %p1126_p10 = pneg %p1125_p9 }
  0x24   : > { %p1133_p0 = pnand %p1132_p13, %p1126_p10 }
  0x26   : > { %1136 = shalt.err (!%p1133_p0)
}
  0x27   : > { %s1342_s20 = smov [#allocation9]   ;;  %s1137_s27 = scalar_lea.vmem %s227_s11, 64 }
  0x28   : > { %1042 = dma.vmem_to_smem (!%p1438_p6), %s238_s29, 16, %s1342_s20, [#allocation10]  }
  0x29   : > { %p1138_p2 = scmp.ne.s32.totalorder %s227_s11, %s1137_s27  ;;  %p1145_p3 = scmp.lt.s32.totalorder %s227_s11, %s227_s11 }
  0x2a   : > { %p1146_p1 = scmp.lt.s32.totalorder %s1137_s27, %s1137_s27 }
  0x2b   : > { %p1140_p5 = pnand %p1138_p2, %p1124_p8 }
  0x2c   : > { %p1147_p7 = por %p1146_p1, %p1145_p3 }
  0x2d   : > { %p1141_p4 = pneg %p1140_p5 }
  0x2f   : > { %p1148_p9 = pnand %p1147_p7, %p1141_p4 }
  0x31   : > { %1151 = shalt.err (!%p1148_p9)
}
  0x32   : > { %s1343_s28 = smov [#allocation8]   ;;  %s1152_s29 = scalar_lea.vmem %s1445_s15, 64 }
  0x33   : > { %1039 = dma.vmem_to_smem (!%p1438_p6), %s227_s11, 64, %s1343_s28, [#allocation5]  }
  0x34   : > { %p1153_p10 = scmp.ne.s32.totalorder %s1445_s15, %s1152_s29  ;;  %p1160_p13 = scmp.lt.s32.totalorder %s1445_s15, %s1445_s15 }
  0x35   : > { %p1161_p0 = scmp.lt.s32.totalorder %s1152_s29, %s1152_s29 }
  0x36   : > { %p1155_p11 = pnand %p1153_p10, %p1124_p8 }
  0x37   : > { %p1162_p1 = por %p1161_p0, %p1160_p13 }
  0x38   : > { %p1156_p12 = pneg %p1155_p11 }
  0x3a   : > { %p1163_p3 = pnand %p1162_p1, %p1156_p12 }
  0x3c   : > { %1166 = shalt.err (!%p1163_p3)
}
  0x3d   : > { %s1344_s9 = smov [#allocation11]   ;;  %s1167_s13 = scalar_lea.vmem %s260_s18, 16 }
  0x3e   : > { %1045 = dma.vmem_to_smem (!%p1438_p6), %s1445_s15, 64, %s1344_s9, [#allocation10]  }
  0x3f   : > { %p1168_p4 = scmp.ne.s32.totalorder %s260_s18, %s1167_s13  ;;  %p1175_p7 = scmp.lt.s32.totalorder %s260_s18, %s260_s18 }
  0x40   : > { %p1176_p9 = scmp.lt.s32.totalorder %s1167_s13, %s1167_s13 }
  0x41   : > { %p1170_p2 = pnand %p1168_p4, %p1124_p8 }
  0x42   : > { %p1177_p10 = por %p1176_p9, %p1175_p7 }
  0x43   : > { %p1171_p5 = pneg %p1170_p2 }
  0x45   : > { %p1178_p11 = pnand %p1177_p10, %p1171_p5 }
  0x47   : > { %1181 = shalt.err (!%p1178_p11)
}
  0x48   : > { %s1345_s14 = smov [#allocation12]   ;;  %s937_s15 = sadd.s32 4294967294, %s1340_s26  }
  0x49   : > { %1048 = dma.vmem_to_smem (!%p1438_p6), %s260_s18, 16, %s1345_s14, [#allocation13]  }
  0x4a   : > { %s40_s16 = sadd.s32 1, %s1336_s25  ;;  %s49_s17 = sadd.s32 1, %s1328_s23 }
  0x4b   : > { %p42_p8 = scmp.ge.s32.totalorder %s40_s16, 2  ;;  %p56_p12 = scmp.ne.s32.totalorder %s1328_s23, %s1324_s22 }
  0x4c   : > { %p57_p13 = scmp.eq.s32.totalorder %s1340_s26, 0  ;;  %p62_p1 = scmp.ne.s32.totalorder %s1324_s22, %s1320_s21 }
  0x4d   : > { %s1942_s16 = smov (%p42_p8, %s40_s16), 0  ;;  %p200_p6 = scmp.eq.s32.totalorder %s936_s30, 1 }
  0x4e   : > { %1918 = sst [smem:[#allocation22_spill]] %s1942_s16  ;;  %p1489_p0 = por %p57_p13, %p56_p12 }
  0x4f   : > { %s44_s18 = ssub.s32 %s1336_s25, %s1942_s16  ;;  %p1920_p4 = scmp.ne.s32.totalorder %s1912_s7, 0 }
  0x50   : > { %p47_p3 = scmp.eq.s32.totalorder %s44_s18, 0  ;;  %p1505_p5 = por %p200_p6, %p56_p12 }
  0x51   : > { %p1501_p2 = por %p1920_p4, %p62_p1  ;;  %p206_p7 = scmp.eq.s32.totalorder %s937_s15, 1 }
  0x52   : > { %s1922_s20 = scalar_select %p1505_p5, 1, 0 }
  0x53   : > { %s1921_s19 = scalar_select %p1501_p2, 1, 0 }
  0x54   : > { %s1510_s27 = scalar_select %p47_p3, %s1328_s23, %s49_s17  }
  0x55   : > { %p1512_p9 = por %p206_p7, %p62_p1  ;;  %p1064_p10 = scmp.lt.s32.totalorder %s1340_s26, 2 }
  0x56   : > { %s1518_s29 = sand.u32 1, %s1328_s23   ;;  %s1899_s30 = sshll.u32 %s1336_s25, 7 }
  0x57   : > { %s1923_s28 = scalar_select %p1512_p9, 1, 0 }
  0x58   : > { %s1898_s9 = sshll.u32 %s1518_s29, 3  ;;  %s1924_s0 = sld [smem:[#allocation23_spill]] }
  0x59   : > { %s274_s14 = scalar_lea.vmem [#allocation2], %s1898_s9  ;;  %p1533_p11 = pnand %p1064_p10, %p1489_p0 }
  0x5a   : > { %s284_s15 = sshll.u32 %s274_s14, 4  ;;  %s271_s18 = scalar_lea.sflag [#allocation3], %s1518_s29  ;;  %s1537_s15 = int_to_ptr.vmem [resolvable:$true] %s284_s15 }
  0x5b   : > { %p1184_p12 = pneg %p1533_p11 }
  0x5e   : > { %s1527_s13 = scalar_lea.hbm %s1924_s0, %s1899_s30  ;;  %s1187_s12 = scalar_lea.hbm %s1924_s0, 256 }
  0x5f   : > { %s1182_s10 = scalar_lea.hbm %s1527_s13, 128  ;;  %p1188_p0 = scmp.lt.u32.totalorder %s1527_s13, %s1924_s0 }
  0x60   : > { %p1183_p8 = scmp.ne.s32.totalorder %s1527_s13, %s1182_s10  ;;  %p1189_p6 = scmp.lt.u32.totalorder %s1187_s12, %s1182_s10 }
  0x61   : > { %p1191_p4 = scmp.lt.u32.totalorder %s1182_s10, %s1527_s13 }
  0x62   : > { %p1185_p13 = pnand %p1184_p12, %p1183_p8  ;;  %p1190_p3 = por %p1189_p6, %p1188_p0 }
  0x64   : > { %p1186_p1 = pneg %p1185_p13  ;;  %p1192_p7 = por %p1191_p4, %p1190_p3 }
  0x66   : > { %p1193_p10 = pnand %p1192_p7, %p1186_p1 }
  0x68   : > { %1196 = shalt.err (!%p1193_p10)
}
  0x69   : > { %s1197_s2 = scalar_lea.vmem %s1537_s15, 128  ;;  %s1346_s11 = smov [#allocation2]  }
  0x6a   : > { %p1198_p8 = scmp.ne.s32.totalorder %s1537_s15, %s1197_s2  ;;  %s1202_s14 = sshll.u32 %s1346_s11, 4  ;;  %s1203_s14 = int_to_ptr.vmem [resolvable:$false] %s1202_s14 }
  0x6b   : > { %s1204_s30 = scalar_lea.vmem %s1203_s14, 256  ;;  %p1205_p5 = scmp.lt.s32.totalorder %s1537_s15, %s1203_s14 }
  0x6c   : > { %p1200_p13 = pnand %p1198_p8, %p1184_p12  ;;  %p1206_p0 = scmp.lt.s32.totalorder %s1204_s30, %s1197_s2 }
  0x6e   : > { %p1201_p9 = pneg %p1200_p13  ;;  %p1207_p6 = por %p1206_p0, %p1205_p5 }
  0x70   : > { %p1208_p3 = pnand %p1207_p6, %p1201_p9 }
  0x72   : > { %1211 = shalt.err (!%p1208_p3)
}
  0x73   : > { %1052 = dma.hbm_to_vmem [thread:$0]  (!%p1533_p11), %s1527_s13, 128, %s1537_s15, %s271_s18  }
  0x74   : > { %s1926_s9 = sshll.u32 %s1336_s25, 7  ;;  %s1927_s1 = sld [smem:[#allocation24_spill]] }
  0x75   : > { %s1928_s14 = sshll.u32 %s1518_s29, 3  ;;  %s292_s0 = scalar_lea.sflag [#allocation7], %s1518_s29 }
  0x76   : > { %s295_s2 = scalar_lea.vmem [#allocation6], %s1928_s14 }
  0x77   : > { %s305_s30 = sshll.u32 %s295_s2, 4  ;;  %s306_s30 = int_to_ptr.vmem [resolvable:$true] %s305_s30 }
  0x7a   : > { %s1570_s11 = scalar_lea.hbm %s1927_s1, %s1926_s9  ;;  %s1217_s18 = scalar_lea.hbm %s1927_s1, 256 }
  0x7b   : > { %s1212_s3 = scalar_lea.hbm %s1570_s11, 128  ;;  %p1218_p4 = scmp.lt.u32.totalorder %s1570_s11, %s1927_s1 }
  0x7c   : > { %p1213_p5 = scmp.ne.s32.totalorder %s1570_s11, %s1212_s3  ;;  %p1219_p7 = scmp.lt.u32.totalorder %s1217_s18, %s1212_s3 }
  0x7d   : > { %p1221_p8 = scmp.lt.u32.totalorder %s1212_s3, %s1570_s11 }
  0x7e   : > { %p1215_p9 = pnand %p1213_p5, %p1184_p12  ;;  %p1220_p10 = por %p1219_p7, %p1218_p4 }
  0x80   : > { %p1216_p1 = pneg %p1215_p9  ;;  %p1222_p13 = por %p1221_p8, %p1220_p10 }
  0x82   : > { %p1223_p0 = pnand %p1222_p13, %p1216_p1 }
  0x84   : > { %1226 = shalt.err (!%p1223_p0)
}
  0x85   : > { %s1227_s29 = scalar_lea.vmem %s306_s30, 128  ;;  %s1347_s12 = smov [#allocation6]  }
  0x86   : > { %p1228_p6 = scmp.ne.s32.totalorder %s306_s30, %s1227_s29  ;;  %s1232_s14 = sshll.u32 %s1347_s12, 4  ;;  %s1233_s14 = int_to_ptr.vmem [resolvable:$false] %s1232_s14 }
  0x87   : > { %s1234_s2 = scalar_lea.vmem %s1233_s14, 256  ;;  %p1235_p9 = scmp.lt.s32.totalorder %s306_s30, %s1233_s14 }
  0x88   : > { %p1230_p3 = pnand %p1228_p6, %p1184_p12  ;;  %p1236_p2 = scmp.lt.s32.totalorder %s1234_s2, %s1227_s29 }
  0x8a   : > { %p1231_p5 = pneg %p1230_p3  ;;  %p1237_p4 = por %p1236_p2, %p1235_p9 }
  0x8c   : > { %p1238_p7 = pnand %p1237_p4, %p1231_p5 }
  0x8e   : > { %1241 = shalt.err (!%p1238_p7)
}
  0x8f   : > { %1055 = dma.hbm_to_vmem [thread:$0]  (!%p1533_p11), %s1570_s11, 128, %s306_s30, %s292_s0  }
  0x90   : > { %p1929_p1 = scmp.ne.s32.totalorder %s1913_s8, 0 }
  0x91   : > { %s1597_s3 = sand.u32 (!%p1929_p1), 1, %s1324_s22   ;;  %p1930_p2 = scmp.ne.s32.totalorder (!%p1929_p1), %s1921_s19, 0 }
  0x92   : > { %314 = sbr.rel (%p1929_p1) target bundleno = 249 (0xf9), region = 44  ;;  %s1600_s13 = sshll.u32 (!%p1929_p1), %s1597_s3, 3 }
  0x93   : > { %s317_s15 = scalar_lea.sflag (!%p1929_p1), [#allocation3], %s1597_s3 }
  0x99   : > { %1295 = dma.done.wait (%p1930_p2), %s317_s15, 128  }
  0x9a   : > { %1297 = vsyncadd (%p1930_p2), %s317_s15, 4294967168  ;;  %s326_s0 = scalar_lea.sflag [#allocation7], %s1597_s3  ;;  %s329_s8 = scalar_lea.vmem [#allocation6], %s1600_s13 }
  0x9b   : > { %1299 = dma.done.wait (%p1930_p2), %s326_s0, 128  }
  0x9c   : > { %1301 = vsyncadd (%p1930_p2), %s326_s0, 4294967168  ;;  %p1931_p11 = scmp.ne.s32.totalorder %s1912_s7, 0 }
  0x9e   : > { %1303 = dma.done.wait (%p1931_p11), [#allocation5], 64  }
  0x9f   : > { %1305 = vsyncadd (%p1931_p11), [#allocation5], 4294967232 }
  0xa0   : > { %1307 = dma.done.wait (%p1931_p11), [#allocation10], 80  }
  0xa1   : > { %1309 = vsyncadd (%p1931_p11), [#allocation10], 4294967216 }
  0xa2   : > { %1311 = dma.done.wait (%p1931_p11), [#allocation13], 16  }
  0xa3   : > { %1313 = vsyncadd (%p1931_p11), [#allocation13], 4294967280 }
  0xa4   : > { %350 = sfence }
  0xa5   : > { %s384_s19 = sld [smem:[#allocation8]]  ;;  %s958_s17 = sld [smem:[#allocation8 + $0x1]]  ;;  %v509_v0 = vlaneseq  ;;  %v1632_v1 = vld [vmem:[%s329_s8] sm:$0xff]  ;;  %vm552_vm0 = vcmask 1040384   ;;  %vm555_vm1 = vcmask 1041408   ;;  %vm558_vm2 = vcmask 1042432  }
  0xa6   : > { %s960_s11 = sld [smem:[#allocation8 + $0x2]]  ;;  %s962_s30 = sld [smem:[#allocation8 + $0x3]] }
  0xa7   : > { %s1626_s9 = sld [smem:[#allocation9]]  ;;  %s965_s29 = sld [smem:[#allocation8 + $0x81]]  ;;  %v1636_v2 = vshrl.u32 %v509_v0, 7 }
  0xa8   : > { %s964_s10 = sld [smem:[#allocation8 + $0x80]]  ;;  %s1628_s12 = sld [smem:[#allocation8 + $0x82]] }
  0xa9   : > { %s1630_s14 = sld [smem:[#allocation8 + $0x83]]  ;;  %s1634_s2 = sld [smem:[#allocation8 + $0x100]]  ;;  %v1653_v13 = vsub.s32 0, %v1636_v2  ;;  %v515_v57 = vsub.s32 4, %v1636_v2 }
  0xaa   : > { %s1638_s7 = sld [smem:[#allocation8 + $0x101]]  ;;  %s1640_s15 = sld [smem:[#allocation8 + $0x102]] }
  0xab   : > { %v385_v3 = vstv %s384_s19  ;;  %v388_v4 = vstv %s958_s17  ;;  %s1642_s0 = sld [smem:[#allocation8 + $0x103]]  ;;  %s1647_s8 = sld [smem:[#allocation9 + $0x1]] }
  0xac   : > { %v396_v5 = vstv %s960_s11  ;;  %v386_v6 = vmul.f32 %v385_v3, %v1632_v1  ;;  %v389_v7 = vmul.f32 %v388_v4, %v1632_v1  ;;  %v404_v9 = vstv %s962_s30  ;;  %s1649_s19 = sld [smem:[#allocation8 + $0x180]]  ;;  %s1657_s17 = sld [smem:[#allocation8 + $0x181]] }
  0xad   : > { %v397_v8 = vmul.f32 %v396_v5, %v1632_v1  ;;  %v405_v10 = vmul.f32 %v404_v9, %v1632_v1  ;;  %v419_v12 = vstv %s965_s29  ;;  %s1659_s11 = sld [smem:[#allocation8 + $0x182]]  ;;  %v412_v19 = vstv %s1626_s9  ;;  %s1664_s30 = sld [smem:[#allocation8 + $0x183]] }
  0xae   : > { %v416_v11 = vstv %s964_s10  ;;  %v959_v14 = vrot.slane %v389_v7, 9  ;;  %v420_v17 = vmul.f32 %v419_v12, %v1632_v1  ;;  %v427_v20 = vstv %s1628_s12  ;;  %s1672_s9 = sld [smem:[#allocation9 + $0x2]]  ;;  %s1683_s10 = sld [smem:[#allocation9 + $0x3]] }
  0xaf   : > { %v961_v15 = vrot.slane %v397_v8, 10  ;;  %v417_v16 = vmul.f32 %v416_v11, %v1632_v1  ;;  %v963_v18 = vrot.slane %v405_v10, 11  ;;  %v435_v21 = vstv %s1630_s14  ;;  %s1685_s29 = sld [smem:[#allocation11]]  ;;  %s1690_s12 = sld [smem:[#allocation11 + $0x1]] }
  0xb0   : > { %v394_v22 = vadd.f32 %v959_v14, %v386_v6  ;;  %v966_v23 = vrot.slane %v420_v17, 9  ;;  %v428_v24 = vmul.f32 %v427_v20, %v1632_v1  ;;  %v436_v25 = vmul.f32 %v435_v21, %v1632_v1  ;;  %s1692_s14 = sld [smem:[#allocation11 + $0x2]]  ;;  %s1719_s18 = sld [smem:[#allocation11 + $0x103]] }
  0xb1   : > { %v447_v26 = vstv %s1634_s2  ;;  %v450_v27 = vstv %s1638_s7  ;;  %v458_v28 = vstv %s1640_s15  ;;  %v466_v29 = vstv %s1642_s0  ;;  %s1696_s2 = sld [smem:[#allocation11 + $0x3]]  ;;  %s1698_s7 = sld [smem:[#allocation12]] }
  0xb2   : > { %v402_v30 = vadd.f32 %v961_v15, %v394_v22  ;;  %v425_v31 = vadd.f32 %v966_v23, %v417_v16  ;;  %v968_v32 = vrot.slane %v428_v24, 10  ;;  %v970_v33 = vrot.slane %v436_v25, 11  ;;  %s1700_s15 = sld [smem:[#allocation11 + $0x80]]  ;;  %s1702_s0 = sld [smem:[#allocation11 + $0x81]] }
  0xb3   : > { %v448_v34 = vmul.f32 %v447_v26, %v1632_v1  ;;  %v451_v35 = vmul.f32 %v450_v27, %v1632_v1  ;;  %v459_v36 = vmul.f32 %v458_v28, %v1632_v1  ;;  %v467_v37 = vmul.f32 %v466_v29, %v1632_v1  ;;  %s1721_s1 = sld [smem:[#allocation12 + $0x2]]  ;;  %s1724_s4 = sld [smem:[#allocation11 + $0x180]] }
  0xb4   : > { %v410_v38 = vadd.f32 %v963_v18, %v402_v30  ;;  %v433_v39 = vadd.f32 %v968_v32, %v425_v31  ;;  %v443_v40 = vstv %s1647_s8  ;;  %v478_v41 = vstv %s1649_s19  ;;  %s1705_s8 = sld [smem:[#allocation11 + $0x82]]  ;;  %s1707_s19 = sld [smem:[#allocation11 + $0x83]] }
  0xb5   : > { %v974_v42 = vrot.slane %v451_v35, 9  ;;  %v976_v43 = vrot.slane %v459_v36, 10  ;;  %v978_v44 = vrot.slane %v467_v37, 11  ;;  %v479_v45 = vmul.f32 %v478_v41, %v1632_v1  ;;  %s1726_s5 = sld [smem:[#allocation11 + $0x181]]  ;;  %s1728_s16 = sld [smem:[#allocation11 + $0x182]] }
  0xb6   : > { %v413_v46 = vadd.f32 %v412_v19, %v410_v38  ;;  %v441_v47 = vadd.f32 %v970_v33, %v433_v39  ;;  %v481_v48 = vstv %s1657_s17  ;;  %v489_v49 = vstv %s1659_s11  ;;  %s1709_s17 = sld [smem:[#allocation12 + $0x1]]  ;;  %s1711_s11 = sld [smem:[#allocation11 + $0x100]] }
  0xb7   : > { %v456_v50 = vadd.f32 %v974_v42, %v448_v34  ;;  %v482_v51 = vmul.f32 %v481_v48, %v1632_v1  ;;  %v490_v52 = vmul.f32 %v489_v49, %v1632_v1  ;;  %v497_v53 = vstv %s1664_s30  ;;  %s1715_s30 = sld [smem:[#allocation11 + $0x101]]  ;;  %s1730_s25 = sld [smem:[#allocation11 + $0x183]] }
  0xb8   : > { %v414_v54 = vmax.f32 %v413_v46, 0.0  ;;  %v444_v55 = vadd.f32 %v443_v40, %v441_v47  ;;  %v498_v56 = vmul.f32 %v497_v53, %v1632_v1  ;;  %v474_v62 = vstv %s1672_s9  ;;  %s1717_s9 = sld [smem:[#allocation11 + $0x102]]  ;;  %p1933_p10 = scmp.ne.s32.totalorder %s1922_s20, 0 }
  0xb9   : > { %v464_v58 = vadd.f32 %v976_v43, %v456_v50  ;;  %v982_v59 = vrot.slane %v482_v51, 9  ;;  %v984_v60 = vrot.slane %v490_v52, 10  ;;  %v505_v8 = vstv %s1683_s10 }
  0xba   : > { %v445_v61 = vmax.f32 %v444_v55, 0.0  ;;  %v986_v1 = vrot.slane %v498_v56, 11  ;;  %v512_v2 = vrot.slane %v414_v54, %v1653_v13  ;;  %v516_v6 = vrot.slane %v414_v54, %v515_v57 }
  0xbb   : > { %v472_v63 = vadd.f32 %v978_v44, %v464_v58  ;;  %v487_v0 = vadd.f32 %v982_v59, %v479_v45  ;;  %v562_v12 = vstv %s1685_s29  ;;  %v566_v14 = vstv %s1690_s12  ;;  %s769_s12 = scalar_lea.sflag [#allocation4], %s1597_s3 }
  0xbc   : > { %v523_v3 = vrot.slane %v445_v61, %v1653_v13  ;;  %v527_v7 = vrot.slane %v445_v61, %v515_v57  ;;  %v578_v19 = vstv %s1692_s14  ;;  %v590_v20 = vstv %s1696_s2 }
  0xbd   : > { %v475_v4 = vadd.f32 %v474_v62, %v472_v63  ;;  %v495_v5 = vadd.f32 %v984_v60, %v487_v0  ;;  %v602_v21 = vstv %s1698_s7  ;;  %v606_v22 = vstv %s1700_s15 }
  0xbe   : > { %v553_v11 = vsel %vm552_vm0, %v512_v2, %v523_v3  ;;  %v554_v18 = vsel %vm552_vm0, %v516_v6, %v527_v7  ;;  %v610_v24 = vstv %s1702_s0  ;;  %v622_v25 = vstv %s1705_s8 }
  0xbf   : > { %v476_v9 = vmax.f32 %v475_v4, 0.0  ;;  %v503_v10 = vadd.f32 %v986_v1, %v495_v5  ;;  %v634_v26 = vstv %s1707_s19  ;;  %v646_v29 = vstv %s1709_s17 }
  0xc0   : > { %v650_v30 = vstv %s1711_s11  ;;  %v654_v33 = vstv %s1715_s30  ;;  %v666_v34 = vstv %s1717_s9  ;;  %v678_v35 = vstv %s1719_s18  ;;  %s1801_s18 = sld [smem:[#allocation12 + $0x3]] }
  0xc1   : > { %v506_v15 = vadd.f32 %v505_v8, %v503_v10  ;;  %v534_v16 = vrot.slane %v476_v9, %v1653_v13  ;;  %v538_v17 = vrot.slane %v476_v9, %v515_v57  ;;  %v690_v36 = vstv %s1721_s1  ;;  %s1932_s1 = scalar_lea.vmem [#allocation2], %s1600_s13 }
  0xc2   : > { %v694_v37 = vstv %s1724_s4  ;;  %v698_v38 = vstv %s1726_s5  ;;  %v710_v41 = vstv %s1728_s16  ;;  %v722_v42 = vstv %s1730_s25  ;;  %s1013_s4 = sshll.u32 %s1332_s24, 7  ;;  %s379_s5 = scalar_lea.vmem [#allocation14], %s1600_s13 }
  0xc3   : > { %v507_v23 = vmax.f32 %v506_v15, 0.0  ;;  %v556_v27 = vsel %vm555_vm1, %v553_v11, %v534_v16  ;;  %v557_v28 = vsel %vm555_vm1, %v554_v18, %v538_v17  ;;  %s785_s25 = sshll.u32 %s379_s5, 4  ;;  %s1839_s29 = scalar_lea.hbm %s1894_s6, %s1013_s4  ;;  %s1841_s25 = int_to_ptr.vmem [resolvable:$true] %s785_s25 }
  0xc4   : > { %s1242_s14 = scalar_lea.vmem %s1841_s25, 128  ;;  %s1348_s24 = smov [#allocation14]  }
  0xc5   : > { %v545_v31 = vrot.slane %v507_v23, %v1653_v13  ;;  %v549_v32 = vrot.slane %v507_v23, %v515_v57  ;;  %p1243_p12 = scmp.ne.s32.totalorder %s1841_s25, %s1242_s14  ;;  %s1246_s13 = sshll.u32 %s1348_s24, 4  ;;  %s1247_s13 = int_to_ptr.vmem [resolvable:$false] %s1246_s13 }
  0xc6   : > { %s1248_s2 = scalar_lea.vmem %s1247_s13, 256  ;;  %p1249_p0 = scmp.lt.s32.totalorder %s1841_s25, %s1247_s13 }
  0xc7   : > { %v1756_v39 = vsel %vm558_vm2, %v556_v27, %v545_v31  ;;  %v1759_v40 = vsel %vm558_vm2, %v557_v28, %v549_v32  ;;  %p1244_p8 = pnand %p1243_p12, %p1933_p10  ;;  %p1250_p6 = scmp.lt.s32.totalorder %s1248_s2, %s1242_s14 }
  0xc8   : > { %v563_v43 = vmul.f32 %v562_v12, %v1756_v39  ;;  %v564_v44 = vmul.f32 %v562_v12, %v1759_v40  ;;  %v567_v13 = vmul.f32 %v566_v14, %v1756_v39  ;;  %v568_v45 = vmul.f32 %v566_v14, %v1759_v40 }
  0xc9   : > { %v579_v46 = vmul.f32 %v578_v19, %v1756_v39  ;;  %v580_v47 = vmul.f32 %v578_v19, %v1759_v40  ;;  %v591_v48 = vmul.f32 %v590_v20, %v1756_v39  ;;  %v592_v49 = vmul.f32 %v590_v20, %v1759_v40  ;;  %p1245_p13 = pneg %p1244_p8  ;;  %p1251_p3 = por %p1250_p6, %p1249_p0 }
  0xca   : > { %v571_v50 = vrot.slane %v567_v13, 1  ;;  %v572_v51 = vrot.slane %v568_v45, 1  ;;  %v607_v52 = vmul.f32 %v606_v22, %v1756_v39  ;;  %v608_v53 = vmul.f32 %v606_v22, %v1759_v40 }
  0xcb   : > { %v583_v54 = vrot.slane %v579_v46, 2  ;;  %v584_v55 = vrot.slane %v580_v47, 2  ;;  %v595_v56 = vrot.slane %v591_v48, 3  ;;  %v596_v57 = vrot.slane %v592_v49, 3  ;;  %p1252_p5 = pnand %p1251_p3, %p1245_p13 }
  0xcc   : > { %v575_v58 = vadd.f32 %v571_v50, %v563_v43  ;;  %v576_v59 = vadd.f32 %v572_v51, %v564_v44  ;;  %v611_v60 = vmul.f32 %v610_v24, %v1756_v39  ;;  %v612_v61 = vmul.f32 %v610_v24, %v1759_v40 }
  0xcd   : > { %v623_v62 = vmul.f32 %v622_v25, %v1756_v39  ;;  %v624_v63 = vmul.f32 %v622_v25, %v1759_v40  ;;  %v635_v0 = vmul.f32 %v634_v26, %v1756_v39  ;;  %v636_v1 = vmul.f32 %v634_v26, %v1759_v40 }
  0xce   : > { %v587_v2 = vadd.f32 %v583_v54, %v575_v58  ;;  %v588_v3 = vadd.f32 %v584_v55, %v576_v59  ;;  %v615_v4 = vrot.slane %v611_v60, 1  ;;  %v616_v5 = vrot.slane %v612_v61, 1 }
  0xcf   : > { %v627_v6 = vrot.slane %v623_v62, 2  ;;  %v628_v7 = vrot.slane %v624_v63, 2  ;;  %v639_v8 = vrot.slane %v635_v0, 3  ;;  %v640_v9 = vrot.slane %v636_v1, 3 }
  0xd0   : > { %v599_v10 = vadd.f32 %v595_v56, %v587_v2  ;;  %v600_v11 = vadd.f32 %v596_v57, %v588_v3  ;;  %v619_v12 = vadd.f32 %v615_v4, %v607_v52  ;;  %v620_v14 = vadd.f32 %v616_v5, %v608_v53 }
  0xd1   : > { %v651_v15 = vmul.f32 %v650_v30, %v1756_v39  ;;  %v652_v16 = vmul.f32 %v650_v30, %v1759_v40  ;;  %v655_v17 = vmul.f32 %v654_v33, %v1756_v39  ;;  %v656_v18 = vmul.f32 %v654_v33, %v1759_v40 }
  0xd2   : > { %v603_v19 = vadd.f32 %v602_v21, %v599_v10  ;;  %v604_v20 = vadd.f32 %v602_v21, %v600_v11  ;;  %v631_v22 = vadd.f32 %v627_v6, %v619_v12  ;;  %v632_v23 = vadd.f32 %v628_v7, %v620_v14 }
  0xd3   : > { %v659_v24 = vrot.slane %v655_v17, 1  ;;  %v660_v25 = vrot.slane %v656_v18, 1  ;;  %v667_v26 = vmul.f32 %v666_v34, %v1756_v39  ;;  %v668_v27 = vmul.f32 %v666_v34, %v1759_v40 }
  0xd4   : > { %v643_v28 = vadd.f32 %v639_v8, %v631_v22  ;;  %v644_v30 = vadd.f32 %v640_v9, %v632_v23  ;;  %v679_v31 = vmul.f32 %v678_v35, %v1756_v39  ;;  %v680_v32 = vmul.f32 %v678_v35, %v1759_v40 }
  0xd5   : > { %v663_v21 = vadd.f32 %v659_v24, %v651_v15  ;;  %v664_v33 = vadd.f32 %v660_v25, %v652_v16  ;;  %v671_v43 = vrot.slane %v667_v26, 2  ;;  %v672_v44 = vrot.slane %v668_v27, 2  ;;  %v761_v16 = vld [vmem:[%s1932_s1] sm:$0xff] }
  0xd6   : > { %v647_v13 = vadd.f32 %v646_v29, %v643_v28  ;;  %v648_v34 = vadd.f32 %v646_v29, %v644_v30  ;;  %v683_v45 = vrot.slane %v679_v31, 3  ;;  %v684_v46 = vrot.slane %v680_v32, 3 }
  0xd7   : > { %v675_v47 = vadd.f32 %v671_v43, %v663_v21  ;;  %v676_v48 = vadd.f32 %v672_v44, %v664_v33  ;;  %v695_v35 = vmul.f32 %v694_v37, %v1756_v39  ;;  %v696_v49 = vmul.f32 %v694_v37, %v1759_v40 }
  0xd8   : > { %v699_v50 = vmul.f32 %v698_v38, %v1756_v39  ;;  %v700_v29 = vmul.f32 %v698_v38, %v1759_v40  ;;  %v711_v51 = vmul.f32 %v710_v41, %v1756_v39  ;;  %v712_v52 = vmul.f32 %v710_v41, %v1759_v40 }
  0xd9   : > { %v687_v53 = vadd.f32 %v683_v45, %v675_v47  ;;  %v688_v54 = vadd.f32 %v684_v46, %v676_v48  ;;  %v723_v55 = vmul.f32 %v722_v42, %v1756_v39  ;;  %v724_v37 = vmul.f32 %v722_v42, %v1759_v40 }
  0xda   : > { %v703_v56 = vrot.slane %v699_v50, 1  ;;  %v704_v57 = vrot.slane %v700_v29, 1  ;;  %v715_v58 = vrot.slane %v711_v51, 2  ;;  %v716_v59 = vrot.slane %v712_v52, 2 }
  0xdb   : > { %v691_v38 = vadd.f32 %v690_v36, %v687_v53  ;;  %v692_v60 = vadd.f32 %v690_v36, %v688_v54  ;;  %v727_v61 = vrot.slane %v723_v55, 3  ;;  %v728_v62 = vrot.slane %v724_v37, 3 }
  0xdc   : > { %v707_v41 = vadd.f32 %v703_v56, %v695_v35  ;;  %v708_v63 = vadd.f32 %v704_v57, %v696_v49  ;;  %v739_v0 = vrot.slane %v647_v13, 7  ;;  %v740_v1 = vrot.slane %v648_v34, 7 }
  0xdd   : > { %v734_v3 = vstv %s1801_s18  ;;  %v745_v40 = vrot.slane %v691_v38, 6  ;;  %v746_v42 = vrot.slane %v692_v60, 6 }
  0xde   : > { %v719_v2 = vadd.f32 %v715_v58, %v707_v41  ;;  %v720_v39 = vadd.f32 %v716_v59, %v708_v63  ;;  %v755_v6 = vsel %vm552_vm0, %v603_v19, %v739_v0  ;;  %v756_v36 = vsel %vm552_vm0, %v604_v20, %v740_v1 }
  0xdf   : > { %v757_v9 = vsel %vm555_vm1, %v755_v6, %v745_v40  ;;  %v758_v10 = vsel %vm555_vm1, %v756_v36, %v746_v42 }
  0xe0   : > { %v731_v4 = vadd.f32 %v727_v61, %v719_v2  ;;  %v732_v5 = vadd.f32 %v728_v62, %v720_v39 }
  0xe2   : > { %v735_v7 = vadd.f32 %v734_v3, %v731_v4  ;;  %v736_v8 = vadd.f32 %v734_v3, %v732_v5 }
  0xe4   : > { %v751_v11 = vrot.slane %v735_v7, 5  ;;  %v752_v12 = vrot.slane %v736_v8, 5 }
  0xe6   : > { %v759_v14 = vsel %vm558_vm2, %v757_v9, %v751_v11  ;;  %v760_v15 = vsel %vm558_vm2, %v758_v10, %v752_v12 }
  0xe7   : > { %v764_v17 = vcombine.low %v759_v14, %v760_v15 }
  0xe9   : > { %v766_v18 = vmul.f32 %v764_v17, %v761_v16 }
  0xeb   : > { %767 = vst [vmem:[%s379_s5] sm:$0xff] %v766_v18 }
  0xec   : > { %1255 = shalt.err (!%p1252_p5)
}
  0xed   : > { %s1256_s3 = scalar_lea.hbm %s1839_s29, 128  ;;  %s1260_s0 = scalar_lea.hbm %s1894_s6, 256 }
  0xee   : > { %p1257_p9 = scmp.ne.s32.totalorder %s1839_s29, %s1256_s3  ;;  %p1261_p1 = scmp.lt.u32.totalorder %s1839_s29, %s1894_s6 }
  0xef   : > { %p1262_p2 = scmp.lt.u32.totalorder %s1260_s0, %s1256_s3  ;;  %p1264_p12 = scmp.lt.u32.totalorder %s1256_s3, %s1839_s29 }
  0xf0   : > { %p1258_p4 = pnand %p1257_p9, %p1933_p10 }
  0xf1   : > { %p1263_p11 = por %p1262_p2, %p1261_p1 }
  0xf2   : > { %p1259_p7 = pneg %p1258_p4 }
  0xf3   : > { %p1265_p8 = por %p1264_p12, %p1263_p11 }
  0xf5   : > { %p1266_p13 = pnand %p1265_p8, %p1259_p7 }
  0xf7   : > { %1269 = shalt.err (!%p1266_p13)
}
  0xf8   : > { %1034 = dma.vmem_to_hbm [thread:$0]  (%p1933_p10), %s1841_s25, 128, %s1839_s29, %s769_s12  }
  0xf9 PF: > { %s797_s17 = sand.u32 1, %s1320_s21   ;;  %p1934_p0 = scmp.ne.s32.totalorder %s1923_s28, 0 }
  0xfa   : > { %p1935_p6 = scmp.ge.s32.totalorder %s1340_s26, 2  ;;  %s798_s11 = scalar_lea.sflag [#allocation4], %s797_s17 }
  0xfc   : > { %p1057_p3 = pnand %p1935_p6, %p1934_p0 }
  0xfe   : > { %1315 = dma.done.wait (!%p1057_p3), %s798_s11, 128  }
  0xff   : > { %1317 = vsyncadd (!%p1057_p3), %s798_s11, 4294967168  ;;  %s28_s26 = sadd.s32 1, %s1340_s26   ;;  %s1936_s24 = sld [smem:[#allocation21_spill]] }
 0x100   : > { %p25_p5 = scmp.ge.s32.totalorder %s28_s26, 4   ;;  %s1937_s25 = sld [smem:[#allocation22_spill]] }
 0x101   : > { %s1938_s21 = smov %s1324_s22  ;;  %s1939_s22 = smov %s1328_s23 }
 0x102   : > { %s1940_s23 = smov %s1510_s27  ;;  %27 = sbr.rel (!%p25_p5) target bundleno = 18 (0x12), region = 119 }
 0x109   :  { %803 = vsyncpa [#allocation3], 1 }
 0x10a   :  { %805 = vsyncpa [#allocation3 + $0x1], 1 }
 0x10b   :  { %806 = vsyncpa [#allocation7], 1 }
 0x10c   :  { %808 = vsyncpa [#allocation7 + $0x1], 1 }
 0x10d   :  { %809 = vsyncpa [#allocation4], 1 }
 0x10e   :  { %811 = vsyncpa [#allocation4 + $0x1], 1 }
 0x10f   :  { %812 = vsyncpa [#allocation5], 1 }
 0x110   :  { %814 = vsyncpa [#allocation5 + $0x1], 1 }
 0x111   :  { %815 = vsyncpa [#allocation10], 1 }
 0x112   :  { %816 = vsyncpa [#allocation13], 1 }

</bundles_post_ra>
